<compile_context>
chip_gen: v5e
topology: v5e:2x2
jax: 0.10.0
libtpu: 0.0.40
codegen_flags: <defaults>
</compile_context>

<pallas_src>
import math

import jax
import jax.numpy as jnp
from jax import lax
from jax.experimental import pallas as pl
from jax.experimental.pallas import tpu as pltpu


def _cdiv(a, b):
    return -(-a // b)


def _round_up(x, m):
    return _cdiv(x, m) * m


def _tile_rows(n, block_rows, lane=128):
    """Balanced candidate-row tiles: lane-aligned when multi-tile (lane-dense
    logit stores), >=2 grid steps when there is enough work (v7x megacore)."""
    n = max(int(n), 1)
    if n <= 2 * lane:                     # tiny problem: single tile
        tm = _round_up(n, 8)
        return tm, tm
    nt = max(_cdiv(n, block_rows), 2)     # >=2 steps so both v7x cores get work
    tm = _round_up(_cdiv(n, nt), lane)    # balanced, 128-aligned tiles
    return tm, _round_up(n, tm)


# ---------------------------------------------------------------------------
# Fused kernel: K-encoder MLP + batched_expand(Q) + Linear(2O,O)+ReLU + Linear(O,1)
# ---------------------------------------------------------------------------
def _make_fused_kernel(n_enc_layers, gather_chunk=1024):
    n_mlp = 2 * (n_enc_layers + 1)        # (W, b) pairs incl. final projection

    def kernel(*refs):
        assert len(refs) == 3 + 2 * n_mlp + 5 + 1
        idx_ref, k_ref, qe_ref = refs[0], refs[1], refs[2]
        q_wb = refs[3:3 + n_mlp]
        k_wb = refs[3 + n_mlp:3 + 2 * n_mlp]
        w1q_ref, w1k_ref, b1_ref, w2_ref, b2_ref = refs[3 + 2 * n_mlp:-1]
        out_ref = refs[-1]

        def encoder(x, wb):
            """ReLU(Linear)^L then Linear; MXU operands in weight dtype, f32 acc."""
            h = x
            for l in range(n_enc_layers):
                w, b = wb[2 * l][...], wb[2 * l + 1][...]
                h = jnp.dot(h.astype(w.dtype), w,
                            preferred_element_type=jnp.float32)
                h = jnp.maximum(h + b.astype(jnp.float32), 0.0)
            w, b = wb[-2][...], wb[-1][...]
            return jnp.dot(h.astype(w.dtype), w,
                           preferred_element_type=jnp.float32) + b.astype(jnp.float32)

        # --- Q path (tiny: G rows). Recomputed every tile from VMEM-resident
        # inputs so the grid axis stays "parallel" (megacore-safe) without an
        # HBM round trip. ReLU and Linear(W1[:O]) commute with the per-candidate
        # row repeat, so fold them (plus b1) into one (G, O) matrix pre-gather.
        w1q = w1q_ref[...]
        q = encoder(qe_ref[...], q_wb)                                  # (G, O) f32
        qw1 = (jnp.dot(jnp.maximum(q, 0.0).astype(w1q.dtype), w1q,
                       preferred_element_type=jnp.float32)
               + b1_ref[...].astype(jnp.float32))                       # (G, O) f32
        G = qw1.shape[0]

        # --- K path for this candidate tile.
        w1k = w1k_ref[...]
        k = encoder(k_ref[...], k_wb)                                   # (TM, O) f32
        hk = jnp.dot(jnp.maximum(k, 0.0).astype(w1k.dtype), w1k,
                     preferred_element_type=jnp.float32)                # (TM, O) f32

        # --- batched_expand: one-hot MXU gather of the folded Q contribution,
        # chunked over graphs to bound the (TM, G) one-hot VMEM footprint.
        idx = idx_ref[...]                                              # (TM, 1) i32
        TM = idx.shape[0]
        hq = None
        for g0 in range(0, G, gather_chunk):
            gsz = min(gather_chunk, G - g0)
            iota = g0 + lax.broadcasted_iota(jnp.int32, (TM, gsz), 1)
            onehot = (iota == idx).astype(qw1.dtype)                    # f32 0/1
            part = jnp.dot(onehot, qw1[g0:g0 + gsz],
                           preferred_element_type=jnp.float32)
            hq = part if hq is None else hq + part

        h = jnp.maximum(hq + hk, 0.0)                                   # (TM, O) f32

        # --- final Linear(O -> 1), emitted lane-dense as a (1, TM) row by
        # contracting the O axis of h against w2 (A @ B^T, MXU-native pattern).
        w2 = w2_ref[...].astype(jnp.float32)                            # (1, O)
        logits = lax.dot_general(w2, h, (((1,), (1,)), ((), ())),
                                 preferred_element_type=jnp.float32)    # (1, TM)
        out_ref[...] = (logits + b2_ref[0]).astype(out_ref.dtype)

    return kernel


def gapn_logits(q_emb, k_emb, batch_idx, params, *, block_rows=512):
    """Fused forward: candidate logits [C] from state embeddings q_emb [G, D],
    candidate embeddings k_emb [C, D] and 0-based batch_idx [C]."""
    q_mlp, k_mlp, head = params
    w1, b1, w2, b2 = head
    assert len(q_mlp) == len(k_mlp) and len(q_mlp) % 2 == 0
    n_enc_layers = len(q_mlp) // 2 - 1
    G, D = q_emb.shape
    C = k_emb.shape[0]
    O = int(w2.shape[0])

    # Pad graphs to a sublane multiple (padded Q rows are never gathered).
    G8 = _round_up(G, 8)
    if G8 != G:
        q_emb = jnp.pad(q_emb, ((0, G8 - G), (0, 0)))

    # Balanced, lane-aligned candidate tiles (padded rows sliced off below).
    TM, Cp = _tile_rows(C, block_rows)
    num_tiles = Cp // TM
    batch_idx = batch_idx.astype(jnp.int32)
    if Cp != C:
        k_emb = jnp.pad(k_emb, ((0, Cp - C), (0, 0)))
        batch_idx = jnp.pad(batch_idx, (0, Cp - C))      # pads gather graph 0
    idx2d = batch_idx.reshape(Cp, 1)

    w1q, w1k = w1[:O], w1[O:]                 # split Linear(2O,O): no lane concat
    b1r = jnp.reshape(b1, (1, O))
    w2r = jnp.reshape(w2, (1, O))
    b2s = jnp.reshape(b2, (1,)).astype(jnp.float32)      # scalar -> SMEM

    resident = lambda a: pl.BlockSpec(a.shape, lambda i: (0, 0))
    in_specs = (
        [pl.BlockSpec((TM, 1), lambda i: (i, 0)),        # batch_idx tile
         pl.BlockSpec((TM, D), lambda i: (i, 0)),        # k_emb tile
         resident(q_emb)]                                # q_emb: VMEM-resident
        + [resident(p) for p in q_mlp]
        + [resident(p) for p in k_mlp]
        + [resident(w1q), resident(w1k), resident(b1r), resident(w2r),
           pl.BlockSpec(memory_space=pltpu.MemorySpace.SMEM)])   # b2 scalar

    enc_mac = sum(int(w.shape[0]) * int(w.shape[1]) for w in k_mlp[0::2])
    flops = int(2 * (Cp * (enc_mac + O * O + G8 * O + O)
                     + num_tiles * G8 * (enc_mac + O * O)))
    bytes_accessed = int(
        int(q_emb.size) * q_emb.dtype.itemsize
        + int(k_emb.size) * k_emb.dtype.itemsize
        + sum(int(p.size) * p.dtype.itemsize
              for p in (*q_mlp, *k_mlp, w1, b1, w2, b2))
        + Cp * 4       # batch_idx
        + Cp * 4)      # logits

    out = pl.pallas_call(
        _make_fused_kernel(n_enc_layers),
        out_shape=jax.ShapeDtypeStruct((1, Cp), jnp.float32),
        grid_spec=pl.GridSpec(
            grid=(num_tiles,),
            in_specs=in_specs,
            out_specs=pl.BlockSpec((1, TM), lambda i: (0, i)),   # lane-dense logits
        ),
        compiler_params=pltpu.CompilerParams(
            dimension_semantics=("parallel",)),
        cost_estimate=pl.CostEstimate(flops=flops, transcendentals=0,
                                      bytes_accessed=bytes_accessed),
    )(idx2d, k_emb, q_emb, *q_mlp, *k_mlp, w1q, w1k, b1r, w2r, b2s)
    return out[0, :C]


# ---------------------------------------------------------------------------
# Plain-JAX tail: per-graph softmax + Categorical(p * (p > eps)) sampling.
# ---------------------------------------------------------------------------
def _segment_softmax_and_sample(key, logits, batch_idx, num_graphs, eps=1e-4):
    seg_max = jax.ops.segment_max(logits, batch_idx, num_segments=num_graphs)
    ex = jnp.exp(logits - seg_max[batch_idx])
    denom = jax.ops.segment_sum(ex, batch_idx, num_segments=num_graphs)
    probs = ex / denom[batch_idx]

    # batched_sample: Categorical over p*(p>eps) within each graph (Gumbel-max).
    masked = jnp.where(probs > eps, probs, 0.0)
    u = jax.random.uniform(key, probs.shape, minval=1e-7, maxval=1.0 - 1e-7)
    gumbel = -jnp.log(-jnp.log(u))
    score = jnp.where(masked > 0.0, jnp.log(masked) + gumbel, -jnp.inf)

    cand = jnp.arange(probs.shape[0], dtype=jnp.int32)
    seg_best = jax.ops.segment_max(score, batch_idx, num_segments=num_graphs)
    shifted_actions = jax.ops.segment_max(
        jnp.where(score == seg_best[batch_idx], cand, -1),
        batch_idx, num_segments=num_graphs)
    batch_shift = jax.ops.segment_min(cand, batch_idx, num_segments=num_graphs)
    actions = shifted_actions - batch_shift
    action_logprobs = jnp.log(probs[shifted_actions])
    return probs, action_logprobs, actions


def gapn_actor_forward(key, q_emb, k_emb, batch_idx, params, eps=1e-4):
    """q_emb: [G, D] state embeddings (post Q_gnn), k_emb: [C, D] candidate
    embeddings (post K_gnn), batch_idx: [C] graph id per candidate (0-based).
    Returns (probs [C], action_logprobs [G], actions [G])."""
    logits = gapn_logits(q_emb, k_emb, batch_idx, params)
    G = q_emb.shape[0]
    # TODO(synk): ragged per-graph softmax + Categorical sampling kept in plain
    # JAX (data-dependent segments + RNG; not part of the matmul hot path).
    return _segment_softmax_and_sample(key, logits, batch_idx.astype(jnp.int32),
                                       G, eps=eps)


# ---------------------------------------------------------------------------
# Parameter init (nn.Linear-style U(-1/sqrt(fan_in), 1/sqrt(fan_in))) + reference.
# ---------------------------------------------------------------------------
def _linear_init(key, fan_in, fan_out):
    kw, kb = jax.random.split(key)
    bound = 1.0 / math.sqrt(fan_in)
    W = jax.random.uniform(kw, (fan_in, fan_out), jnp.float32, -bound, bound)
    b = jax.random.uniform(kb, (1, fan_out), jnp.float32, -bound, bound)
    return W, b


def init_params(key, in_dim, enc_nb_hidden, enc_nb_layers, enc_nb_output):
    if not isinstance(enc_nb_hidden, list):
        enc_nb_hidden = [enc_nb_hidden] * enc_nb_layers

    def enc(key):
        dims = [in_dim] + enc_nb_hidden + [enc_nb_output]
        p = []
        for i in range(len(dims) - 1):
            key, k = jax.random.split(key)
            W, b = _linear_init(k, dims[i], dims[i + 1])
            p += [W, b]
        return tuple(p)

    kq, kk, k1, k2 = jax.random.split(key, 4)
    q_mlp = enc(kq)
    k_mlp = enc(kk)
    W1, b1 = _linear_init(k1, 2 * enc_nb_output, enc_nb_output)
    W2, b2 = _linear_init(k2, enc_nb_output, 1)
    return (q_mlp, k_mlp, (W1, b1, W2, b2))


def reference_logits(q_emb, k_emb, batch_idx, params):
    q_mlp, k_mlp, head = params
    f32 = lambda t: t.astype(jnp.float32)

    def mlp(x, p):
        ws, bs = p[0::2], p[1::2]
        h = f32(x)
        for w, b in zip(ws[:-1], bs[:-1]):
            h = jnp.maximum(h @ f32(w) + f32(b), 0.0)
        return h @ f32(ws[-1]) + f32(bs[-1])

    Q = mlp(q_emb, q_mlp)                                  # [G, O]
    K = mlp(k_emb, k_mlp)                                  # [C, O]
    W1, b1, W2, b2 = map(f32, head)
    z = jnp.concatenate([Q[batch_idx], K], axis=-1)        # batched_expand + cat
    h = jnp.maximum(jnp.maximum(z, 0.0) @ W1 + b1, 0.0)    # final_layers[0](ReLU), ReLU
    return (h @ W2 + b2)[:, 0]                             # final_layers[1], squeeze(1)


if __name__ == "__main__":
    # Small shapes consistent with the module: GNN embedding dim 32,
    # enc_nb_layers = 2, enc_nb_hidden = 32, enc_nb_output = 16,
    # 4 graphs with [5, 7, 6, 6] candidate graphs each (C = 24).
    G, D, H, O = 4, 32, 32, 16
    counts = [5, 7, 6, 6]
    C = sum(counts)

    key = jax.random.PRNGKey(0)
    key, kq, kk, kp, ks = jax.random.split(key, 5)
    # Stand-ins for the sGAT graph embeddings (see TODO at top of file).
    q_emb = jax.random.normal(kq, (G, D), jnp.float32)
    k_emb = jax.random.normal(kk, (C, D), jnp.float32)
    batch_idx = jnp.concatenate(
        [jnp.full((c,), g, jnp.int32) for g, c in enumerate(counts)])
    params = init_params(kp, D, H, 2, O)

    probs, logp, actions = gapn_actor_forward(ks, q_emb, k_emb, batch_idx, params)
    probs, logp, actions = jax.block_until_ready((probs, logp, actions))

    # --- correctness vs a pure-JAX reference (same sampling key) ---
    ker_logits = gapn_logits(q_emb, k_emb, batch_idx, params)
    ref_logits = reference_logits(q_emb, k_emb, batch_idx, params)
    assert jnp.allclose(ker_logits, ref_logits, rtol=2e-2, atol=2e-2), "logits mismatch"

    rprobs, rlogp, ractions = _segment_softmax_and_sample(ks, ref_logits, batch_idx, G)
    assert probs.shape == (C,) and logp.shape == (G,) and actions.shape == (G,)
    assert jnp.allclose(probs, rprobs, rtol=1e-2, atol=1e-2), "probs mismatch"
    assert jnp.allclose(jax.ops.segment_sum(probs, batch_idx, num_segments=G),
                        1.0, atol=1e-5), "per-graph probs do not sum to 1"
    counts_arr = jnp.array(counts, jnp.int32)
    assert bool(jnp.all(actions >= 0)) and bool(jnp.all(actions < counts_arr))
    shift = jnp.concatenate([jnp.zeros((1,), jnp.int32),
                             jnp.cumsum(counts_arr)[:-1].astype(jnp.int32)])
    assert jnp.allclose(logp, jnp.log(probs[actions + shift]), atol=1e-6)

    # --- multi-tile grid (exercises the lane-dense tiled output path) ---
    G2 = 8
    counts2 = [70, 65, 55, 80, 60, 50, 60, 60]       # C2 = 500 -> 2 tiles of 256
    C2 = sum(counts2)
    key, kq2, kk2, kp2 = jax.random.split(key, 4)
    q_emb2 = jax.random.normal(kq2, (G2, D), jnp.float32)
    k_emb2 = jax.random.normal(kk2, (C2, D), jnp.float32)
    batch_idx2 = jnp.concatenate(
        [jnp.full((c,), g, jnp.int32) for g, c in enumerate(counts2)])
    params2 = init_params(kp2, D, H, 2, O)
    ker2 = jax.block_until_ready(gapn_logits(q_emb2, k_emb2, batch_idx2, params2))
    ref2 = reference_logits(q_emb2, k_emb2, batch_idx2, params2)
    assert ker2.shape == (C2,)
    assert jnp.allclose(ker2, ref2, rtol=2e-2, atol=2e-2), "multi-tile logits mismatch"

    # --- bf16 embeddings/weights (halves the dominant HBM stream) ---
    to_bf16 = lambda t: t.astype(jnp.bfloat16)
    params_bf = jax.tree_util.tree_map(to_bf16, params)
    pb, lb, ab = gapn_actor_forward(ks, to_bf16(q_emb), to_bf16(k_emb),
                                    batch_idx, params_bf)
    pb = jax.block_until_ready(pb)
    assert pb.shape == (C,) and bool(jnp.all(jnp.isfinite(pb)))
    assert jnp.allclose(pb, probs, rtol=1e-1, atol=5e-2), "bf16 probs diverged"
    assert jnp.allclose(jax.ops.segment_sum(pb, batch_idx, num_segments=G),
                        1.0, atol=1e-4)

    print("KERNEL_OK")
</pallas_src>

<mosaic_0001>
module attributes {stable_mosaic.version = 11 : i64} {
  func.func @kernel(%arg0: i32, %arg1: memref<24x1xi32, #tpu.memory_space<vmem>>, %arg2: memref<24x32xf32, #tpu.memory_space<vmem>>, %arg3: memref<8x32xf32, #tpu.memory_space<vmem>>, %arg4: memref<32x32xf32, #tpu.memory_space<vmem>>, %arg5: memref<1x32xf32, #tpu.memory_space<vmem>>, %arg6: memref<32x32xf32, #tpu.memory_space<vmem>>, %arg7: memref<1x32xf32, #tpu.memory_space<vmem>>, %arg8: memref<32x16xf32, #tpu.memory_space<vmem>>, %arg9: memref<1x16xf32, #tpu.memory_space<vmem>>, %arg10: memref<32x32xf32, #tpu.memory_space<vmem>>, %arg11: memref<1x32xf32, #tpu.memory_space<vmem>>, %arg12: memref<32x32xf32, #tpu.memory_space<vmem>>, %arg13: memref<1x32xf32, #tpu.memory_space<vmem>>, %arg14: memref<32x16xf32, #tpu.memory_space<vmem>>, %arg15: memref<1x16xf32, #tpu.memory_space<vmem>>, %arg16: memref<16x16xf32, #tpu.memory_space<vmem>>, %arg17: memref<16x16xf32, #tpu.memory_space<vmem>>, %arg18: memref<1x16xf32, #tpu.memory_space<vmem>>, %arg19: memref<1x16xf32, #tpu.memory_space<vmem>>, %arg20: memref<1xf32, #tpu.memory_space<smem>>, %arg21: memref<1x24xf32, #tpu.memory_space<vmem>>) attributes {dimension_semantics = [#tpu.dimension_semantics<parallel>], iteration_bounds = array<i64: 1>, scalar_prefetch = 0 : i64, scratch_operands = 0 : i64, tpu.core_type = #tpu.core_type<tc>, window_params = [{transform_indices = @transform_0, window_bounds = array<i64: 24, 1>}, {transform_indices = @transform_1, window_bounds = array<i64: 24, 32>}, {pipeline_mode = #tpu.pipeline_mode<synchronous>, transform_indices = @transform_2, window_bounds = array<i64: 8, 32>}, {pipeline_mode = #tpu.pipeline_mode<synchronous>, transform_indices = @transform_3, window_bounds = array<i64: 32, 32>}, {pipeline_mode = #tpu.pipeline_mode<synchronous>, transform_indices = @transform_4, window_bounds = array<i64: 1, 32>}, {pipeline_mode = #tpu.pipeline_mode<synchronous>, transform_indices = @transform_5, window_bounds = array<i64: 32, 32>}, {pipeline_mode = #tpu.pipeline_mode<synchronous>, transform_indices = @transform_6, window_bounds = array<i64: 1, 32>}, {pipeline_mode = #tpu.pipeline_mode<synchronous>, transform_indices = @transform_7, window_bounds = array<i64: 32, 16>}, {pipeline_mode = #tpu.pipeline_mode<synchronous>, transform_indices = @transform_8, window_bounds = array<i64: 1, 16>}, {pipeline_mode = #tpu.pipeline_mode<synchronous>, transform_indices = @transform_9, window_bounds = array<i64: 32, 32>}, {pipeline_mode = #tpu.pipeline_mode<synchronous>, transform_indices = @transform_10, window_bounds = array<i64: 1, 32>}, {pipeline_mode = #tpu.pipeline_mode<synchronous>, transform_indices = @transform_11, window_bounds = array<i64: 32, 32>}, {pipeline_mode = #tpu.pipeline_mode<synchronous>, transform_indices = @transform_12, window_bounds = array<i64: 1, 32>}, {pipeline_mode = #tpu.pipeline_mode<synchronous>, transform_indices = @transform_13, window_bounds = array<i64: 32, 16>}, {pipeline_mode = #tpu.pipeline_mode<synchronous>, transform_indices = @transform_14, window_bounds = array<i64: 1, 16>}, {pipeline_mode = #tpu.pipeline_mode<synchronous>, transform_indices = @transform_15, window_bounds = array<i64: 16, 16>}, {pipeline_mode = #tpu.pipeline_mode<synchronous>, transform_indices = @transform_16, window_bounds = array<i64: 16, 16>}, {pipeline_mode = #tpu.pipeline_mode<synchronous>, transform_indices = @transform_17, window_bounds = array<i64: 1, 16>}, {pipeline_mode = #tpu.pipeline_mode<synchronous>, transform_indices = @transform_18, window_bounds = array<i64: 1, 16>}, {transform_indices = @transform_19, window_bounds = array<i64: 1>}, {transform_indices = @transform_20, window_bounds = array<i64: 1, 24>}]} {
    %c0 = arith.constant 0 : index
    %c0_0 = arith.constant 0 : index
    %0 = vector.load %arg16[%c0, %c0_0] : memref<16x16xf32, #tpu.memory_space<vmem>>, vector<16x16xf32>
    %c0_1 = arith.constant 0 : index
    %c0_2 = arith.constant 0 : index
    %1 = vector.load %arg3[%c0_1, %c0_2] : memref<8x32xf32, #tpu.memory_space<vmem>>, vector<8x32xf32>
    %c0_3 = arith.constant 0 : index
    %c0_4 = arith.constant 0 : index
    %2 = vector.load %arg4[%c0_3, %c0_4] : memref<32x32xf32, #tpu.memory_space<vmem>>, vector<32x32xf32>
    %c0_5 = arith.constant 0 : index
    %c0_6 = arith.constant 0 : index
    %3 = vector.load %arg5[%c0_5, %c0_6] : memref<1x32xf32, #tpu.memory_space<vmem>>, vector<1x32xf32>
    %cst = arith.constant dense<0.000000e+00> : vector<8x32xf32>
    %4 = tpu.matmul %1, %2, %cst {dimension_numbers = #tpu.dot_dimension_numbers<[1], [0], [0], [1], [0, 0, 1, 1], [], []>} : vector<8x32xf32>, vector<32x32xf32>, vector<8x32xf32> -> vector<8x32xf32>
    %5 = vector.broadcast %3 : vector<1x32xf32> to vector<8x32xf32>
    %6 = arith.addf %4, %5 : vector<8x32xf32>
    %cst_7 = arith.constant 0.000000e+00 : f32
    %7 = vector.broadcast %cst_7 : f32 to vector<8x32xf32>
    %8 = arith.maximumf %6, %7 : vector<8x32xf32>
    %c0_8 = arith.constant 0 : index
    %c0_9 = arith.constant 0 : index
    %9 = vector.load %arg6[%c0_8, %c0_9] : memref<32x32xf32, #tpu.memory_space<vmem>>, vector<32x32xf32>
    %c0_10 = arith.constant 0 : index
    %c0_11 = arith.constant 0 : index
    %10 = vector.load %arg7[%c0_10, %c0_11] : memref<1x32xf32, #tpu.memory_space<vmem>>, vector<1x32xf32>
    %cst_12 = arith.constant dense<0.000000e+00> : vector<8x32xf32>
    %11 = tpu.matmul %8, %9, %cst_12 {dimension_numbers = #tpu.dot_dimension_numbers<[1], [0], [0], [1], [0, 0, 1, 1], [], []>} : vector<8x32xf32>, vector<32x32xf32>, vector<8x32xf32> -> vector<8x32xf32>
    %12 = vector.broadcast %10 : vector<1x32xf32> to vector<8x32xf32>
    %13 = arith.addf %11, %12 : vector<8x32xf32>
    %cst_13 = arith.constant 0.000000e+00 : f32
    %14 = vector.broadcast %cst_13 : f32 to vector<8x32xf32>
    %15 = arith.maximumf %13, %14 : vector<8x32xf32>
    %c0_14 = arith.constant 0 : index
    %c0_15 = arith.constant 0 : index
    %16 = vector.load %arg8[%c0_14, %c0_15] : memref<32x16xf32, #tpu.memory_space<vmem>>, vector<32x16xf32>
    %c0_16 = arith.constant 0 : index
    %c0_17 = arith.constant 0 : index
    %17 = vector.load %arg9[%c0_16, %c0_17] : memref<1x16xf32, #tpu.memory_space<vmem>>, vector<1x16xf32>
    %cst_18 = arith.constant dense<0.000000e+00> : vector<8x16xf32>
    %18 = tpu.matmul %15, %16, %cst_18 {dimension_numbers = #tpu.dot_dimension_numbers<[1], [0], [0], [1], [0, 0, 1, 1], [], []>} : vector<8x32xf32>, vector<32x16xf32>, vector<8x16xf32> -> vector<8x16xf32>
    %19 = vector.broadcast %17 : vector<1x16xf32> to vector<8x16xf32>
    %20 = arith.addf %18, %19 : vector<8x16xf32>
    %cst_19 = arith.constant 0.000000e+00 : f32
    %21 = vector.broadcast %cst_19 : f32 to vector<8x16xf32>
    %22 = arith.maximumf %20, %21 : vector<8x16xf32>
    %cst_20 = arith.constant dense<0.000000e+00> : vector<8x16xf32>
    %23 = tpu.matmul %22, %0, %cst_20 {dimension_numbers = #tpu.dot_dimension_numbers<[1], [0], [0], [1], [0, 0, 1, 1], [], []>} : vector<8x16xf32>, vector<16x16xf32>, vector<8x16xf32> -> vector<8x16xf32>
    %c0_21 = arith.constant 0 : index
    %c0_22 = arith.constant 0 : index
    %24 = vector.load %arg18[%c0_21, %c0_22] : memref<1x16xf32, #tpu.memory_space<vmem>>, vector<1x16xf32>
    %25 = vector.broadcast %24 : vector<1x16xf32> to vector<8x16xf32>
    %26 = arith.addf %23, %25 : vector<8x16xf32>
    %c0_23 = arith.constant 0 : index
    %c0_24 = arith.constant 0 : index
    %27 = vector.load %arg17[%c0_23, %c0_24] : memref<16x16xf32, #tpu.memory_space<vmem>>, vector<16x16xf32>
    %c0_25 = arith.constant 0 : index
    %c0_26 = arith.constant 0 : index
    %28 = vector.load %arg2[%c0_25, %c0_26] : memref<24x32xf32, #tpu.memory_space<vmem>>, vector<24x32xf32>
    %c0_27 = arith.constant 0 : index
    %c0_28 = arith.constant 0 : index
    %29 = vector.load %arg10[%c0_27, %c0_28] : memref<32x32xf32, #tpu.memory_space<vmem>>, vector<32x32xf32>
    %c0_29 = arith.constant 0 : index
    %c0_30 = arith.constant 0 : index
    %30 = vector.load %arg11[%c0_29, %c0_30] : memref<1x32xf32, #tpu.memory_space<vmem>>, vector<1x32xf32>
    %cst_31 = arith.constant dense<0.000000e+00> : vector<24x32xf32>
    %31 = tpu.matmul %28, %29, %cst_31 {dimension_numbers = #tpu.dot_dimension_numbers<[1], [0], [0], [1], [0, 0, 1, 1], [], []>} : vector<24x32xf32>, vector<32x32xf32>, vector<24x32xf32> -> vector<24x32xf32>
    %32 = vector.broadcast %30 : vector<1x32xf32> to vector<24x32xf32>
    %33 = arith.addf %31, %32 : vector<24x32xf32>
    %cst_32 = arith.constant 0.000000e+00 : f32
    %34 = vector.broadcast %cst_32 : f32 to vector<24x32xf32>
    %35 = arith.maximumf %33, %34 : vector<24x32xf32>
    %c0_33 = arith.constant 0 : index
    %c0_34 = arith.constant 0 : index
    %36 = vector.load %arg12[%c0_33, %c0_34] : memref<32x32xf32, #tpu.memory_space<vmem>>, vector<32x32xf32>
    %c0_35 = arith.constant 0 : index
    %c0_36 = arith.constant 0 : index
    %37 = vector.load %arg13[%c0_35, %c0_36] : memref<1x32xf32, #tpu.memory_space<vmem>>, vector<1x32xf32>
    %cst_37 = arith.constant dense<0.000000e+00> : vector<24x32xf32>
    %38 = tpu.matmul %35, %36, %cst_37 {dimension_numbers = #tpu.dot_dimension_numbers<[1], [0], [0], [1], [0, 0, 1, 1], [], []>} : vector<24x32xf32>, vector<32x32xf32>, vector<24x32xf32> -> vector<24x32xf32>
    %39 = vector.broadcast %37 : vector<1x32xf32> to vector<24x32xf32>
    %40 = arith.addf %38, %39 : vector<24x32xf32>
    %cst_38 = arith.constant 0.000000e+00 : f32
    %41 = vector.broadcast %cst_38 : f32 to vector<24x32xf32>
    %42 = arith.maximumf %40, %41 : vector<24x32xf32>
    %c0_39 = arith.constant 0 : index
    %c0_40 = arith.constant 0 : index
    %43 = vector.load %arg14[%c0_39, %c0_40] : memref<32x16xf32, #tpu.memory_space<vmem>>, vector<32x16xf32>
    %c0_41 = arith.constant 0 : index
    %c0_42 = arith.constant 0 : index
    %44 = vector.load %arg15[%c0_41, %c0_42] : memref<1x16xf32, #tpu.memory_space<vmem>>, vector<1x16xf32>
    %cst_43 = arith.constant dense<0.000000e+00> : vector<24x16xf32>
    %45 = tpu.matmul %42, %43, %cst_43 {dimension_numbers = #tpu.dot_dimension_numbers<[1], [0], [0], [1], [0, 0, 1, 1], [], []>} : vector<24x32xf32>, vector<32x16xf32>, vector<24x16xf32> -> vector<24x16xf32>
    %46 = vector.broadcast %44 : vector<1x16xf32> to vector<24x16xf32>
    %47 = arith.addf %45, %46 : vector<24x16xf32>
    %cst_44 = arith.constant 0.000000e+00 : f32
    %48 = vector.broadcast %cst_44 : f32 to vector<24x16xf32>
    %49 = arith.maximumf %47, %48 : vector<24x16xf32>
    %cst_45 = arith.constant dense<0.000000e+00> : vector<24x16xf32>
    %50 = tpu.matmul %49, %27, %cst_45 {dimension_numbers = #tpu.dot_dimension_numbers<[1], [0], [0], [1], [0, 0, 1, 1], [], []>} : vector<24x16xf32>, vector<16x16xf32>, vector<24x16xf32> -> vector<24x16xf32>
    %c0_46 = arith.constant 0 : index
    %c0_47 = arith.constant 0 : index
    %51 = vector.load %arg1[%c0_46, %c0_47] : memref<24x1xi32, #tpu.memory_space<vmem>>, vector<24x1xi32>
    %52 = tpu.iota {dimensions = array<i32: 1>} : vector<24x8xi32>
    %c0_i32 = arith.constant 0 : i32
    %53 = vector.broadcast %c0_i32 : i32 to vector<24x8xi32>
    %54 = arith.addi %53, %52 : vector<24x8xi32>
    %55 = vector.broadcast %51 : vector<24x1xi32> to vector<24x8xi32>
    %56 = arith.cmpi eq, %54, %55 : vector<24x8xi32>
    %57 = arith.extui %56 : vector<24x8xi1> to vector<24x8xi32>
    %58 = arith.sitofp %57 : vector<24x8xi32> to vector<24x8xf32>
    %cst_48 = arith.constant dense<0.000000e+00> : vector<24x16xf32>
    %59 = tpu.matmul %58, %26, %cst_48 {dimension_numbers = #tpu.dot_dimension_numbers<[1], [0], [0], [1], [0, 0, 1, 1], [], []>} : vector<24x8xf32>, vector<8x16xf32>, vector<24x16xf32> -> vector<24x16xf32>
    %60 = arith.addf %59, %50 : vector<24x16xf32>
    %cst_49 = arith.constant 0.000000e+00 : f32
    %61 = vector.broadcast %cst_49 : f32 to vector<24x16xf32>
    %62 = arith.maximumf %60, %61 : vector<24x16xf32>
    %c0_50 = arith.constant 0 : index
    %c0_51 = arith.constant 0 : index
    %63 = vector.load %arg19[%c0_50, %c0_51] : memref<1x16xf32, #tpu.memory_space<vmem>>, vector<1x16xf32>
    %cst_52 = arith.constant dense<0.000000e+00> : vector<1x24xf32>
    %64 = tpu.matmul %63, %62, %cst_52 {dimension_numbers = #tpu.dot_dimension_numbers<[1], [1], [0], [0], [0, 0, 1, 0], [], []>} : vector<1x16xf32>, vector<24x16xf32>, vector<1x24xf32> -> vector<1x24xf32>
    %c0_53 = arith.constant 0 : index
    %65 = memref.load %arg20[%c0_53] : memref<1xf32, #tpu.memory_space<smem>>
    %66 = vector.broadcast %65 : f32 to vector<1x24xf32>
    %67 = arith.addf %64, %66 : vector<1x24xf32>
    %c0_54 = arith.constant 0 : index
    %c0_55 = arith.constant 0 : index
    %68 = vector.load %arg21[%c0_54, %c0_55] : memref<1x24xf32, #tpu.memory_space<vmem>>, vector<1x24xf32>
    tpu.vector_store %arg21[%c0_54, %c0_55], %67 {strides = array<i32>} : memref<1x24xf32, #tpu.memory_space<vmem>>, vector<1x24xf32>,
    return
  }
  func.func @transform_0(%arg0: i32) -> (i32, i32) {
    %c0_i32 = arith.constant 0 : i32
    %c0_i32_0 = arith.constant 0 : i32
    return %arg0, %c0_i32 : i32, i32
  }
  func.func @transform_1(%arg0: i32) -> (i32, i32) {
    %c0_i32 = arith.constant 0 : i32
    %c0_i32_0 = arith.constant 0 : i32
    return %arg0, %c0_i32 : i32, i32
  }
  func.func @transform_2(%arg0: i32) -> (i32, i32) {
    %c0_i32 = arith.constant 0 : i32
    %c0_i32_0 = arith.constant 0 : i32
    %c0_i32_1 = arith.constant 0 : i32
    return %c0_i32, %c0_i32_0 : i32, i32
  }
  func.func @transform_3(%arg0: i32) -> (i32, i32) {
    %c0_i32 = arith.constant 0 : i32
    %c0_i32_0 = arith.constant 0 : i32
    %c0_i32_1 = arith.constant 0 : i32
    return %c0_i32, %c0_i32_0 : i32, i32
  }
  func.func @transform_4(%arg0: i32) -> (i32, i32) {
    %c0_i32 = arith.constant 0 : i32
    %c0_i32_0 = arith.constant 0 : i32
    %c0_i32_1 = arith.constant 0 : i32
    return %c0_i32, %c0_i32_0 : i32, i32
  }
  func.func @transform_5(%arg0: i32) -> (i32, i32) {
    %c0_i32 = arith.constant 0 : i32
    %c0_i32_0 = arith.constant 0 : i32
    %c0_i32_1 = arith.constant 0 : i32
    return %c0_i32, %c0_i32_0 : i32, i32
  }
  func.func @transform_6(%arg0: i32) -> (i32, i32) {
    %c0_i32 = arith.constant 0 : i32
    %c0_i32_0 = arith.constant 0 : i32
    %c0_i32_1 = arith.constant 0 : i32
    return %c0_i32, %c0_i32_0 : i32, i32
  }
  func.func @transform_7(%arg0: i32) -> (i32, i32) {
    %c0_i32 = arith.constant 0 : i32
    %c0_i32_0 = arith.constant 0 : i32
    %c0_i32_1 = arith.constant 0 : i32
    return %c0_i32, %c0_i32_0 : i32, i32
  }
  func.func @transform_8(%arg0: i32) -> (i32, i32) {
    %c0_i32 = arith.constant 0 : i32
    %c0_i32_0 = arith.constant 0 : i32
    %c0_i32_1 = arith.constant 0 : i32
    return %c0_i32, %c0_i32_0 : i32, i32
  }
  func.func @transform_9(%arg0: i32) -> (i32, i32) {
    %c0_i32 = arith.constant 0 : i32
    %c0_i32_0 = arith.constant 0 : i32
    %c0_i32_1 = arith.constant 0 : i32
    return %c0_i32, %c0_i32_0 : i32, i32
  }
  func.func @transform_10(%arg0: i32) -> (i32, i32) {
    %c0_i32 = arith.constant 0 : i32
    %c0_i32_0 = arith.constant 0 : i32
    %c0_i32_1 = arith.constant 0 : i32
    return %c0_i32, %c0_i32_0 : i32, i32
  }
  func.func @transform_11(%arg0: i32) -> (i32, i32) {
    %c0_i32 = arith.constant 0 : i32
    %c0_i32_0 = arith.constant 0 : i32
    %c0_i32_1 = arith.constant 0 : i32
    return %c0_i32, %c0_i32_0 : i32, i32
  }
  func.func @transform_12(%arg0: i32) -> (i32, i32) {
    %c0_i32 = arith.constant 0 : i32
    %c0_i32_0 = arith.constant 0 : i32
    %c0_i32_1 = arith.constant 0 : i32
    return %c0_i32, %c0_i32_0 : i32, i32
  }
  func.func @transform_13(%arg0: i32) -> (i32, i32) {
    %c0_i32 = arith.constant 0 : i32
    %c0_i32_0 = arith.constant 0 : i32
    %c0_i32_1 = arith.constant 0 : i32
    return %c0_i32, %c0_i32_0 : i32, i32
  }
  func.func @transform_14(%arg0: i32) -> (i32, i32) {
    %c0_i32 = arith.constant 0 : i32
    %c0_i32_0 = arith.constant 0 : i32
    %c0_i32_1 = arith.constant 0 : i32
    return %c0_i32, %c0_i32_0 : i32, i32
  }
  func.func @transform_15(%arg0: i32) -> (i32, i32) {
    %c0_i32 = arith.constant 0 : i32
    %c0_i32_0 = arith.constant 0 : i32
    %c0_i32_1 = arith.constant 0 : i32
    return %c0_i32, %c0_i32_0 : i32, i32
  }
  func.func @transform_16(%arg0: i32) -> (i32, i32) {
    %c0_i32 = arith.constant 0 : i32
    %c0_i32_0 = arith.constant 0 : i32
    %c0_i32_1 = arith.constant 0 : i32
    return %c0_i32, %c0_i32_0 : i32, i32
  }
  func.func @transform_17(%arg0: i32) -> (i32, i32) {
    %c0_i32 = arith.constant 0 : i32
    %c0_i32_0 = arith.constant 0 : i32
    %c0_i32_1 = arith.constant 0 : i32
    return %c0_i32, %c0_i32_0 : i32, i32
  }
  func.func @transform_18(%arg0: i32) -> (i32, i32) {
    %c0_i32 = arith.constant 0 : i32
    %c0_i32_0 = arith.constant 0 : i32
    %c0_i32_1 = arith.constant 0 : i32
    return %c0_i32, %c0_i32_0 : i32, i32
  }
  func.func @transform_19(%arg0: i32) -> i32 {
    %c0_i32 = arith.constant 0 : i32
    %c0_i32_0 = arith.constant 0 : i32
    return %c0_i32 : i32
  }
  func.func @transform_20(%arg0: i32) -> (i32, i32) {
    %c0_i32 = arith.constant 0 : i32
    %c0_i32_0 = arith.constant 0 : i32
    return %c0_i32, %arg0 : i32, i32
  }
}

</mosaic_0001>

<bundles_post_ra>
// kernel: tpu_custom_call.1
= control target key start
LH: loop header
LB: loop body
LE: loop exit
PB: predicated region body
PF: predicated region fallthrough
CT: control target
= control target key end

     0   :  { %s1070_s0 = inlined_call_operand.vmem [shape: s32[24,1], index: 0, kind: input, shape index: {}]   ;;  %s1071_s1 = inlined_call_operand.hbm [shape: f32[24,32], index: 1, kind: input, shape index: {}]   ;;  %s1072_s2 = inlined_call_operand.hbm [shape: f32[8,32], index: 2, kind: input, shape index: {}]   ;;  %s1073_s3 = inlined_call_operand.vmem [shape: f32[32,32], index: 3, kind: input, shape index: {}]   ;;  %s1074_s4 = inlined_call_operand.hbm [shape: f32[1,32], index: 4, kind: input, shape index: {}]   ;;  %s1075_s5 = inlined_call_operand.vmem [shape: f32[32,32], index: 5, kind: input, shape index: {}]   ;;  %s1076_s6 = inlined_call_operand.hbm [shape: f32[1,32], index: 6, kind: input, shape index: {}]   ;;  %s1077_s7 = inlined_call_operand.vmem [shape: f32[32,16], index: 7, kind: input, shape index: {}]   ;;  %s1078_s8 = inlined_call_operand.vmem [shape: f32[1,16], index: 8, kind: input, shape index: {}]   ;;  %s1079_s9 = inlined_call_operand.vmem [shape: f32[32,32], index: 9, kind: input, shape index: {}]   ;;  %s1080_s10 = inlined_call_operand.vmem [shape: f32[1,32], index: 10, kind: input, shape index: {}]   ;;  %s1081_s11 = inlined_call_operand.vmem [shape: f32[32,32], index: 11, kind: input, shape index: {}]   ;;  %s1082_s12 = inlined_call_operand.vmem [shape: f32[1,32], index: 12, kind: input, shape index: {}]   ;;  %s1083_s13 = inlined_call_operand.vmem [shape: f32[32,16], index: 13, kind: input, shape index: {}]   ;;  %s1084_s14 = inlined_call_operand.vmem [shape: f32[1,16], index: 14, kind: input, shape index: {}]   ;;  %s1085_s15 = inlined_call_operand.hbm [shape: f32[16,16], index: 15, kind: input, shape index: {}]   ;;  %s1086_s16 = inlined_call_operand.hbm [shape: f32[16,16], index: 16, kind: input, shape index: {}]   ;;  %s1087_s17 = inlined_call_operand.vmem [shape: f32[1,16], index: 17, kind: input, shape index: {}]   ;;  %s1088_s18 = inlined_call_operand.vmem [shape: f32[1,16], index: 18, kind: input, shape index: {}]   ;;  %s1089_s19 = inlined_call_operand.<no memory space> [shape: f32[1], index: 19, kind: input, shape index: {}]   ;;  %s1090_s20 = inlined_call_operand.hbm [shape: f32[1,24], index: 20, kind: output, shape index: {}]  }
   0x1   :  { %1093 = sst [smem:[#allocation20_spill]] %s1070_s0 }
   0x2   :  { %1094 = sst [smem:[#allocation21_spill]] %s1071_s1 }
   0x3   :  { %1095 = sst [smem:[#allocation22_spill]] %s1072_s2 }
   0x4   :  { %1096 = sst [smem:[#allocation23_spill]] %s1073_s3 }
   0x5   :  { %1097 = sst [smem:[#allocation24_spill]] %s1074_s4 }
   0x6   :  { %1098 = sst [smem:[#allocation25_spill]] %s1089_s19 }
   0x7   :  { %1099 = sst [smem:[#allocation26_spill]] %s1090_s20 }
   0x8   :  { %26 = vsyncpa [#allocation4], 0 }
   0x9   :  { %27 = vsyncpa [#allocation7], 0 }
   0xa   :  { %28 = vsyncpa [#allocation10], 0 }
   0xb   :  { %29 = vsyncpa [#allocation13], 0  ;;  %s1100_s23 = sld [smem:[#allocation22_spill]] }
  0x11   :  { %s51_s24 = sshll.u32 %s1100_s23, 4  ;;  %s52_s24 = int_to_ptr.hbm [resolvable:$true] %s51_s24 }
  0x12   :  { %30 = vsyncpa [#allocation5], 0  ;;  %s808_s2 = smov [#allocation6]   ;;  %s77_s27 = sshll.u32 %s1076_s6, 4  ;;  %s78_s27 = int_to_ptr.hbm [resolvable:$true] %s77_s27 }
  0x13   :  { %s53_s25 = sshll.u32 %s808_s2, 4  ;;  %s809_s28 = smov [#allocation9]   ;;  %s54_s25 = int_to_ptr.vmem [resolvable:$true] %s53_s25 }
  0x14   :  { %56 = dma.hbm_to_vmem [thread:$0]  %s52_s24, 128, %s54_s25, [#allocation7]  }
  0x15   :  { %s79_s4 = sshll.u32 %s809_s28, 4  ;;  %s1101_s0 = sld [smem:[#allocation21_spill]]  ;;  %s80_s4 = int_to_ptr.vmem [resolvable:$true] %s79_s4 }
  0x16   :  { %82 = dma.hbm_to_vmem [thread:$0]  %s78_s27, 16, %s80_s4, [#allocation10]  }
  0x17   :  { %s810_s1 = smov [#allocation3]   ;;  %s1102_s20 = sld [smem:[#allocation24_spill]] }
  0x18   :  { %s39_s22 = sshll.u32 %s810_s1, 4  ;;  %s811_s3 = smov 128   ;;  %s40_s22 = int_to_ptr.vmem [resolvable:$true] %s39_s22 }
  0x19   :  { %s812_s6 = smov 8   ;;  %s813_s24 = smov [#allocation8]  }
  0x1a   :  { %s66_s25 = sshll.u32 %s813_s24, 4  ;;  %s103_s29 = sshll.u32 %s1085_s15, 4  ;;  %s67_s25 = int_to_ptr.vmem [resolvable:$true] %s66_s25  ;;  %s104_s29 = int_to_ptr.hbm [resolvable:$true] %s103_s29 }
  0x1b   :  { %s37_s21 = sshll.u32 %s1101_s0, 4  ;;  %s116_s30 = sshll.u32 %s1086_s16, 4  ;;  %s38_s21 = int_to_ptr.hbm [resolvable:$true] %s37_s21  ;;  %s117_s30 = int_to_ptr.hbm [resolvable:$true] %s116_s30 }
  0x1c   :  { %45 = dma.hbm_to_vmem [thread:$0]  %s38_s21, 384, %s40_s22, [#allocation4], %s811_s3, %s811_s3, %s812_s6  }
  0x1d   :  { %s64_s19 = sshll.u32 %s1102_s20, 4  ;;  %s814_s0 = smov [#allocation11]   ;;  %s65_s19 = int_to_ptr.hbm [resolvable:$true] %s64_s19 }
  0x1e   :  { %69 = dma.hbm_to_vmem [thread:$0]  %s65_s19, 16, %s67_s25, [#allocation7]  }
  0x1f   :  { %s105_s1 = sshll.u32 %s814_s0, 4  ;;  %s815_s20 = smov [#allocation12]   ;;  %s106_s1 = int_to_ptr.vmem [resolvable:$true] %s105_s1 }
  0x20   :  { %111 = dma.hbm_to_vmem [thread:$0]  %s104_s29, 256, %s106_s1, [#allocation10], %s811_s3, %s811_s3, %s812_s6  }
  0x21   :  { %s118_s21 = sshll.u32 %s815_s20, 4  ;;  %s119_s21 = int_to_ptr.vmem [resolvable:$true] %s118_s21 }
  0x22   :  { %124 = dma.hbm_to_vmem [thread:$0]  %s117_s30, 256, %s119_s21, [#allocation13], %s811_s3, %s811_s3, %s812_s6  }
  0x23   :  { %798 = dma.done.wait [#allocation4], 384  }
  0x24   :  { %799 = vsyncadd [#allocation4], 4294966912 }
  0x25   :  { %800 = dma.done.wait [#allocation7], 144  }
  0x26   :  { %801 = vsyncadd [#allocation7], 4294967152 }
  0x27   :  { %802 = dma.done.wait [#allocation10], 272  }
  0x28   :  { %803 = vsyncadd [#allocation10], 4294967024 }
  0x29   :  { %804 = dma.done.wait [#allocation13], 256  }
  0x2a   :  { %805 = vsyncadd [#allocation13], 4294967040  ;;  %s1103_s16 = sld [smem:[#allocation23_spill]]  ;;  %v194_v2 = vld [vmem:[%s1075_s5 + $0x18] sm:$0xff]  ;;  %vm166_vm0 = vcmask 261120   ;;  %v193_v6 = vld [vmem:[%s1075_s5 + $0x10] sm:$0xff] }
  0x2b   :  { %214 = vmatpush.msra.mxu1 %v194_v2  ;;  %v157_v5 = vld [vmem:[#allocation6] sm:$0xff]  ;;  %v192_v7 = vld [vmem:[%s1075_s5 + $0x8] sm:$0xff]  ;;  %v191_v8 = vld [vmem:[%s1075_s5] sm:$0xff]  ;;  %s1104_s24 = sld [smem:[#allocation20_spill]]  ;;  %v816_v49 = vmov 0   ;;  %vm259_vm1 = vcmask 130048  }
  0x2c   :  { %v291_v9 = vld [vmem:[%s1079_s9 + $0x18] sm:$0xff]  ;;  %v290_v10 = vld [vmem:[%s1079_s9 + $0x10] sm:$0xff]  ;;  %v289_v11 = vld [vmem:[%s1079_s9 + $0x8] sm:$0xff]  ;;  %621 = vset.pattern.permute.xlu0 %v816_v49  ;;  %622 = vset.pattern.permute.xlu1 %v816_v49  ;;  %vm484_vm3 = vcmask 64512   ;;  %s1105_s20 = sld [smem:[#allocation25_spill]]  ;;  %vm558_vm6 = vcmask 188416  }
  0x2d   :  { %215 = vmatpush.msra.mxu1 %v193_v6  ;;  %606 = vmatpush.msra.mxu3 %v291_v9  ;;  %v288_v12 = vld [vmem:[%s1079_s9] sm:$0xff]  ;;  %v286_v13 = vld [vmem:[#allocation3 + $0x8] sm:$0xff]  ;;  %v226_v14 = vld [vmem:[%s1077_s7 + $0x18] sm:$0xff] }
  0x2e   :  { %246 = vmatpush.msra.mxu2 %v226_v14  ;;  %v287_v15 = vld [vmem:[#allocation3 + $0x10] sm:$0xff]  ;;  %v623_v16 = vld [vmem:[#allocation8] ss:$0 sm:$0xff]  ;;  %v224_v22 = vld [vmem:[%s1077_s7 + $0x8] sm:$0xff] }
  0x2f   :  { %216 = vmatpush.msra.mxu1 %v192_v7  ;;  %607 = vmatpush.msra.mxu3 %v290_v10  ;;  %v285_v20 = vld [vmem:[#allocation3] sm:$0xff]  ;;  %v225_v21 = vld [vmem:[%s1077_s7 + $0x10] sm:$0xff]  ;;  %v337_v24 = vld [vmem:[%s1081_s11 + $0x18] sm:$0xff] }
  0x30   :  { %v161_v0 = vld [vmem:[%s1103_s16 + $0x18] sm:$0xff]  ;;  %v160_v1 = vld [vmem:[%s1103_s16 + $0x10] sm:$0xff]  ;;  %v159_v3 = vld [vmem:[%s1103_s16 + $0x8] sm:$0xff]  ;;  %247 = vmatpush.msra.mxu2 %v225_v21 }
  0x31   :  { %182 = vmatpush.msra.mxu0 %v161_v0  ;;  %v158_v4 = vld [vmem:[%s1103_s16] sm:$0xff]  ;;  %217 = vmatpush.msra.mxu1 %v191_v8  ;;  %v336_v25 = vld [vmem:[%s1081_s11 + $0x10] sm:$0xff]  ;;  %v335_v26 = vld [vmem:[%s1081_s11 + $0x8] sm:$0xff] }
  0x32   :  { %608 = vmatpush.msra.mxu3 %v289_v11  ;;  %248 = vmatpush.msra.mxu2 %v224_v22  ;;  %v223_v23 = vld [vmem:[%s1077_s7] sm:$0xff]  ;;  %v156_v42 = vld [vmem:[#allocation11 + $0x8] sm:$0xff]  ;;  %v383_v43 = vld [vmem:[%s1083_s13 + $0x18] sm:$0xff]  ;;  %s818_s7 = smov [#allocation14]  }
  0x33   :  { %183 = vmatpush.msra.mxu0 %v160_v1  ;;  %317 = vmatpush.msrb.mxu1 %v291_v9  ;;  %v334_v27 = vld [vmem:[%s1081_s11] sm:$0xff]  ;;  %v382_v45 = vld [vmem:[%s1083_s13 + $0x10] sm:$0xff]  ;;  %v381_v46 = vld [vmem:[%s1083_s13 + $0x8] sm:$0xff]  ;;  %s565_s21 = sshll.u32 %s818_s7, 4  ;;  %s566_s21 = int_to_ptr.vmem [resolvable:$true] %s565_s21 }
  0x34   :  { %609 = vmatpush.msra.mxu3 %v288_v12  ;;  %249 = vmatpush.msra.mxu2 %v223_v23  ;;  %v624_v28 = vld [vmem:[#allocation9] ss:$0 sm:$0xff]  ;;  %v625_v32 = vld [vmem:[%s1080_s10] ss:$0 sm:$0xff]  ;;  %v155_v44 = vld [vmem:[#allocation11] sm:$0xff]  ;;  %s1106_s10 = sld [smem:[#allocation26_spill]] }
  0x35   :  { %184 = vmatpush.msra.mxu0 %v159_v3  ;;  %318 = vmatpush.msrb.mxu1 %v290_v10  ;;  %v380_v47 = vld [vmem:[%s1083_s13] sm:$0xff]  ;;  %v462_v50 = vld [vmem:[%s1104_s24 + $0x8] sm:$0xff]  ;;  %v463_v51 = vld [vmem:[%s1104_s24 + $0x10] sm:$0xff] }
  0x36   :  { %585 = vmatmul.msk.f32.vlgmr.msra.gmra.mxu3 %vm166_vm0, %v286_v13  ;;  %277 = vmatpush.msrb.mxu2 %v156_v42  ;;  %v461_v48 = vld [vmem:[%s1104_s24] sm:$0xff]  ;;  %v283_v3 = vld [vmem:[#allocation12] sm:$0xff]  ;;  %v817_v13 = vmov 0.0  }
  0x37   :  { %185 = vmatpush.msra.mxu0 %v158_v4  ;;  %319 = vmatpush.msrb.mxu1 %v289_v11  ;;  %v626_v52 = vld [vmem:[%s1078_s8] ss:$0 sm:$0xff]  ;;  %v464_v4 = vlaneseq }
  0x38   :  { %580 = vmatmul.msk.f32.vlgmr.msra.gmra.mxu0 %vm166_vm0, %v157_v5  ;;  %278 = vmatpush.msrb.mxu2 %v155_v44  ;;  %v627_v53 = vld [vmem:[%s1082_s12] ss:$0 sm:$0xff] }
  0x39   :  { %320 = vmatpush.msrb.mxu1 %v288_v12  ;;  %363 = vmatpush.msrb.mxu0 %v337_v24  ;;  %v284_v2 = vld [vmem:[#allocation12 + $0x8] sm:$0xff]  ;;  %v465_v6 = vand.u32 127, %v464_v4 }
  0x3a   :  { %467 = vperm.xlu0 %621, %v461_v48   ;;  %473 = vperm.xlu1 %622, %v463_v51   ;;  %v628_v5 = vld [vmem:[%s1084_s14] ss:$0 sm:$0xff]  ;;  %s567_s19 = sshll.u32 %s1106_s10, 4  ;;  %s568_s19 = int_to_ptr.hbm [resolvable:$true] %s567_s19 }
  0x3b   :  { %364 = vmatpush.msrb.mxu0 %v336_v25  ;;  %v629_v10 = vld [vmem:[%s1087_s17] ss:$0 sm:$0xff] }
  0x3d   :  { %365 = vmatpush.msrb.mxu0 %v335_v26 }
  0x3e   :  { %586 = vmatmul.msk.f32.gmra.mxu3 %vm166_vm0, %v287_v15 }
  0x3f   :  { %366 = vmatpush.msrb.mxu0 %v334_v27 }
  0x42   :  { %470 = vperm.xlu0 %621, %v462_v50  }
  0xac   :  { %v468_v7 = vpop.permute.xlu0 %467  ;;  %v474_v21 = vpop.permute.xlu1 %473 }
  0xad   :  { %vm475_vm2 = vcmp.eq.s32.totalorder %v465_v6, %v468_v7  ;;  %vm477_vm5 = vcmp.eq.s32.totalorder %v465_v6, %v474_v21 }
  0xae   :  { %v596_v14 = vsel %vm475_vm2, 1.0, %v817_v13  ;;  %v598_v25 = vsel %vm477_vm5, 1.0, %v817_v13 }
  0xb5   :  { %v187_v17 = vpop.f32.mrf.mxu0 }
  0xb6   :  { %v188_v18 = vadd.f32 %v623_v16, %v187_v17  ;;  %v471_v17 = vpop.permute.xlu0 %470 }
  0xb7   :  { %vm476_vm4 = vcmp.eq.s32.totalorder %v465_v6, %v471_v17 }
  0xb8   :  { %v190_v19 = vmax.f32 %v188_v18, 0.0 }
  0xb9   :  { %v325_v34 = vpop.f32.mrf.mxu3 }
  0xba   :  { %581 = vmatmul.msk.f32.vlgmr.msra.gmra.mxu1 %vm166_vm0, %v190_v19  ;;  %v326_v37 = vadd.f32 %v625_v32, %v325_v34 }
  0xbb   :  { %409 = vmatpush.msra.mxu1 %v383_v43 }
  0xbc   :  { %v332_v38 = vmax.f32 %v326_v37, 0.0 }
  0xbd   :  { %410 = vmatpush.msra.mxu1 %v382_v45 }
  0xbf   :  { %411 = vmatpush.msra.mxu1 %v381_v46 }
  0xc1   :  { %v328_v39 = vpop.f32.mrf.mxu3  ;;  %412 = vmatpush.msra.mxu1 %v380_v47 }
  0xc2   :  { %584 = vmatmul.msk.f32.vlgmr.msrb.gmra.mxu1 %vm166_vm0, %v285_v20  ;;  %v329_v40 = vadd.f32 %v625_v32, %v328_v39  ;;  %v597_v20 = vsel %vm476_vm4, 1.0, %v817_v13  ;;  %v525_v39 = vstv %s1105_s20 }
  0xc4   :  { %v333_v41 = vmax.f32 %v329_v40, 0.0 }
 0x137   :  { %v219_v29 = vpop.f32.mrf.mxu1 }
 0x138   :  { %v220_v30 = vadd.f32 %v624_v28, %v219_v29 }
 0x13a   :  { %v222_v31 = vmax.f32 %v220_v30, 0.0 }
 0x13c   :  { %582 = vmatmul.msk.f32.vlgmr.msra.gmra.mxu2 %vm166_vm0, %v222_v31 }
 0x13d   :  { %449 = vmatpush.msra.mxu2 %v284_v2 }
 0x13f   :  { %v322_v33 = vpop.f32.mrf.mxu1  ;;  %450 = vmatpush.msra.mxu2 %v283_v3 }
 0x140   :  { %v323_v35 = vadd.f32 %v625_v32, %v322_v33 }
 0x142   :  { %v331_v36 = vmax.f32 %v323_v35, 0.0 }
 0x144   :  { %587 = vmatmul.msk.f32.vlgmr.msrb.gmra.mxu0 %vm166_vm0, %v331_v36 }
 0x14c   :  { %588 = vmatmul.msk.f32.gmra.mxu0 %vm166_vm0, %v332_v38  ;;  %v523_v38 = vld [vmem:[%s1088_s18] sm:$0x1] }
 0x154   :  { %589 = vmatmul.msk.f32.gmra.mxu0 %vm166_vm0, %v333_v41 }
 0x1bf   :  { %v251_v54 = vpop.f32.mrf.mxu2 }
 0x1c0   :  { %v252_v55 = vadd.f32 %v626_v52, %v251_v54 }
 0x1c1   :  { %v368_v56 = vpop.f32.mrf.mxu0 }
 0x1c2   :  { %v254_v57 = vmax.f32 %v252_v55, 0.0  ;;  %v369_v58 = vadd.f32 %v627_v53, %v368_v56 }
 0x1c4   :  { %583 = vmatmul.msk.f32.vlgmr.msrb.gmra.mxu2 %vm259_vm1, %v254_v57  ;;  %v377_v59 = vmax.f32 %v369_v58, 0.0 }
 0x1c6   :  { %590 = vmatmul.msk.f32.vlgmr.msra.gmra.mxu1 %vm166_vm0, %v377_v59 }
 0x1c9   :  { %v371_v60 = vpop.f32.mrf.mxu0 }
 0x1ca   :  { %v372_v61 = vadd.f32 %v627_v53, %v371_v60 }
 0x1cc   :  { %v378_v62 = vmax.f32 %v372_v61, 0.0 }
 0x1ce   :  { %591 = vmatmul.msk.f32.gmra.mxu1 %vm166_vm0, %v378_v62 }
 0x1d1   :  { %v374_v63 = vpop.f32.mrf.mxu0 }
 0x1d2   :  { %v375_v0 = vadd.f32 %v627_v53, %v374_v63 }
 0x1d4   :  { %v379_v1 = vmax.f32 %v375_v0, 0.0 }
 0x1d6   :  { %592 = vmatmul.msk.f32.gmra.mxu1 %vm166_vm0, %v379_v1 }
 0x243   :  { %v414_v8 = vpop.f32.mrf.mxu1 }
 0x244   :  { %v415_v9 = vadd.f32 %v628_v5, %v414_v8 }
 0x246   :  { %v423_v11 = vmax.f32 %v415_v9, 0.0 }
 0x247   :  { %v280_v12 = vpop.f32.mrf.mxu2 }
 0x248   :  { %v281_v15 = vadd.f32 %v629_v10, %v280_v12  ;;  %593 = vmatmul.msk.f32.vlgmr.msra.gmra.mxu2 %vm259_vm1, %v423_v11 }
 0x24a   :  { %509 = vmatpush.msrb.mxu3 %v281_v15 }
 0x24b   :  { %599 = vmatmul.msk.f32.vlgmr.msrb.gmra.mxu3 %vm484_vm3, %v596_v14  ;;  %v417_v16 = vpop.f32.mrf.mxu1 }
 0x24c   :  { %v418_v18 = vadd.f32 %v628_v5, %v417_v16 }
 0x24e   :  { %v424_v19 = vmax.f32 %v418_v18, 0.0 }
 0x250   :  { %594 = vmatmul.msk.f32.gmra.mxu2 %vm259_vm1, %v424_v19 }
 0x253   :  { %600 = vmatmul.msk.f32.gmra.mxu3 %vm484_vm3, %v597_v20  ;;  %v420_v22 = vpop.f32.mrf.mxu1 }
 0x254   :  { %v421_v23 = vadd.f32 %v628_v5, %v420_v22 }
 0x256   :  { %v425_v24 = vmax.f32 %v421_v23, 0.0 }
 0x258   :  { %595 = vmatmul.msk.f32.gmra.mxu2 %vm259_vm1, %v425_v24 }
 0x25b   :  { %601 = vmatmul.msk.f32.gmra.mxu3 %vm484_vm3, %v598_v25 }
 0x2cb   :  { %v452_v26 = vpop.f32.mrf.mxu2 }
 0x2ce   :  { %v511_v27 = vpop.f32.mrf.mxu3 }
 0x2cf   :  { %v512_v35 = vadd.f32 %v511_v27, %v452_v26 }
 0x2d1   :  { %v520_v37 = vmax.f32 %v512_v35, 0.0 }
 0x2d3   :  { %v455_v28 = vpop.f32.mrf.mxu2 }
 0x2d6   :  { %v514_v29 = vpop.f32.mrf.mxu3 }
 0x2d7   :  { %v515_v33 = vadd.f32 %v514_v29, %v455_v28 }
 0x2d9   :  { %v521_v36 = vmax.f32 %v515_v33, 0.0 }
 0x2db   :  { %v458_v30 = vpop.f32.mrf.mxu2 }
 0x2de   :  { %v517_v31 = vpop.f32.mrf.mxu3 }
 0x2df   :  { %v518_v32 = vadd.f32 %v517_v31, %v458_v30 }
 0x2e1   :  { %v522_v34 = vmax.f32 %v518_v32, 0.0 }
 0x2e3   :  { %602 = vmatpush.xpose.msk.msra.mxu0 %vm259_vm1, %v522_v34 }
 0x2e7   :  { %603 = vmatpush.xpose.msk.msra.mxu0 %vm259_vm1, %v521_v36 }
 0x2eb   :  { %604 = vmatpush.xpose.msk.msra.mxu0 %vm259_vm1, %v520_v37 }
 0x2ee   :  { %605 = vmatmul.msk.f32.vlgmr.msra.gmra.mxu0 %vm259_vm1, %v523_v38 }
 0x36b   :  { %v555_v40 = vpop.f32.mrf.mxu0 }
 0x36c   :  { %v556_v41 = vadd.f32 %v555_v40, %v525_v39 }
 0x36e   :  { %559 = vst.msk [vmem:[#allocation14] sm:$0x1] %vm558_vm6, %v556_v41 }
 0x36f   :  { %570 = dma.vmem_to_hbm [thread:$0]  %s566_s21, 16, %s568_s19, [#allocation5]  }
 0x370   :  { %806 = dma.done.wait [#allocation5], 16  }
 0x371   :  { %807 = vsyncadd [#allocation5], 4294967280 }
 0x372   :  { %575 = vsyncpa [#allocation4], 1 }
 0x373   :  { %576 = vsyncpa [#allocation7], 1 }
 0x374   :  { %577 = vsyncpa [#allocation10], 1 }
 0x375   :  { %578 = vsyncpa [#allocation13], 1 }
 0x376   :  { %579 = vsyncpa [#allocation5], 1 }

</bundles_post_ra>
